<compile_context>
chip_gen: v7x
topology: tpu7x:2x2x1
jax: 0.10.0
libtpu: 0.0.40
codegen_flags: <defaults>
</compile_context>

<pallas_src>
import jax
import jax.numpy as jnp
from jax.experimental import pallas as pl
from jax.experimental.pallas import tpu as pltpu


def _round_up(x, m):
    return ((x + m - 1) // m) * m


def _csgrbm_kernel(dw_ref, db_ref, xt_ref, p0_ref, p1_ref):
    # Single MXU matmul: logit difference z = dW @ X^T   -> (dz, TILE_N)
    z = jnp.dot(dw_ref[...], xt_ref[...], preferred_element_type=jnp.float32)
    z = z + db_ref[...]                      # (dz, 1) bias, broadcast over lanes
    # Numerically stable sigmoid == softmax([l0, l1])[..., 1]
    e = jnp.exp(-jnp.abs(z))                 # EUP
    p1 = jnp.where(z >= 0.0, 1.0, e) / (1.0 + e)
    p1_ref[...] = p1.astype(p1_ref.dtype)
    p0_ref[...] = (1.0 - p1).astype(p0_ref.dtype)


def csgrbm_forward(X, A, b, *, max_tile_n=512):
    """Forward of CSGRBMBernoulliFamily.

    Args:
      X: (N, dx) float32 conditioning input.
      A: (dz, 2, dx) float32 -- weights of the dz nn.Linear(dx, 2) heads.
      b: (dz, 2)   float32 -- biases  of the dz nn.Linear(dx, 2) heads.

    Returns:
      (dz, N, 2) float32 softmax probabilities, matching
      torch.stack([Softmax(Linear_j(X)) for j in range(dz)], dim=0).
    """
    N, dx = X.shape
    dz = A.shape[0]

    # 2-class softmax -> sigmoid of logit difference.  A[:,c,:] is already
    # (dz, dx) so no weight transposes are required.
    dW = A[:, 1, :] - A[:, 0, :]              # (dz, dx)
    db = (b[:, 1] - b[:, 0]).reshape(dz, 1)   # (dz, 1)

    # Lane-dense (dz, N) output layout: put N on the lane axis.  Transpose X
    # once in the wrapper (small) and pad N up to a 128-multiple so all
    # stores are full-width vst.
    Xt = X.T                                  # (dx, N)
    Np = _round_up(N, 128)
    if Np <= max_tile_n:
        tile_n = Np                           # single tile (128-aligned)
    else:
        tile_n = max_tile_n                   # keep modest for v7x 64MiB VMEM
        Np = _round_up(N, tile_n)
    if Np != N:
        Xt = jnp.pad(Xt, ((0, 0), (0, Np - N)))

    grid = (Np // tile_n,)

    p0, p1 = pl.pallas_call(
        _csgrbm_kernel,
        out_shape=(
            jax.ShapeDtypeStruct((dz, Np), jnp.float32),
            jax.ShapeDtypeStruct((dz, Np), jnp.float32),
        ),
        grid=grid,
        in_specs=[
            pl.BlockSpec((dz, dx), lambda i: (0, 0)),       # dW (replicated)
            pl.BlockSpec((dz, 1), lambda i: (0, 0)),        # db (replicated)
            pl.BlockSpec((dx, tile_n), lambda i: (0, i)),   # X^T row-tile
        ],
        out_specs=(
            pl.BlockSpec((dz, tile_n), lambda i: (0, i)),
            pl.BlockSpec((dz, tile_n), lambda i: (0, i)),
        ),
        compiler_params=pltpu.CompilerParams(
            dimension_semantics=("parallel",),   # shard N-tiles across TCs (v7x)
        ),
    )(dW, db, Xt)

    # Glue: interleave into (dz, N, 2) -- the torch.stack(dim=0) layout.
    return jnp.stack([p0[:, :N], p1[:, :N]], axis=-1)


def csgrbm_forward_ref(X, A, b):
    """Pure-JAX reference for correctness checking."""
    logits = jnp.einsum("nd,jcd->jnc", X, A) + b[:, None, :]
    return jax.nn.softmax(logits, axis=-1)


if __name__ == "__main__":
    # Small shapes consistent with the module: dx conditioning dim, dz heads.
    N, dx, dz = 8, 16, 32

    key = jax.random.PRNGKey(0)
    kx, ka, kb = jax.random.split(key, 3)

    X = jax.random.normal(kx, (N, dx), dtype=jnp.float32)
    A = 0.1 * jax.random.normal(ka, (dz, 2, dx), dtype=jnp.float32)
    b = 0.1 * jax.random.normal(kb, (dz, 2), dtype=jnp.float32)

    out = jax.block_until_ready(csgrbm_forward(X, A, b))
    ref = csgrbm_forward_ref(X, A, b)

    assert out.shape == (dz, N, 2), out.shape
    assert jnp.allclose(out, ref, atol=1e-5, rtol=1e-5), float(
        jnp.max(jnp.abs(out - ref))
    )
    # Probabilities over the 2 categories sum to 1.
    assert jnp.allclose(out.sum(-1), 1.0, atol=1e-5)

    print("KERNEL_OK")
</pallas_src>

<mosaic_0001>
module attributes {stable_mosaic.version = 11 : i64} {
  func.func @_csgrbm_kernel(%arg0: i32, %arg1: memref<32x16xf32, #tpu.memory_space<vmem>>, %arg2: memref<32x1xf32, #tpu.memory_space<vmem>>, %arg3: memref<16x128xf32, #tpu.memory_space<vmem>>, %arg4: memref<32x128xf32, #tpu.memory_space<vmem>>, %arg5: memref<32x128xf32, #tpu.memory_space<vmem>>) attributes {dimension_semantics = [#tpu.dimension_semantics<parallel>], iteration_bounds = array<i64: 1>, scalar_prefetch = 0 : i64, scratch_operands = 0 : i64, tpu.core_type = #tpu.core_type<tc>, window_params = [{pipeline_mode = #tpu.pipeline_mode<synchronous>, transform_indices = @transform_0, window_bounds = array<i64: 32, 16>}, {pipeline_mode = #tpu.pipeline_mode<synchronous>, transform_indices = @transform_1, window_bounds = array<i64: 32, 1>}, {transform_indices = @transform_2, window_bounds = array<i64: 16, 128>}, {transform_indices = @transform_3, window_bounds = array<i64: 32, 128>}, {transform_indices = @transform_4, window_bounds = array<i64: 32, 128>}]} {
    %c0 = arith.constant 0 : index
    %c0_0 = arith.constant 0 : index
    %0 = vector.load %arg1[%c0, %c0_0] : memref<32x16xf32, #tpu.memory_space<vmem>>, vector<32x16xf32>
    %c0_1 = arith.constant 0 : index
    %c0_2 = arith.constant 0 : index
    %1 = vector.load %arg3[%c0_1, %c0_2] : memref<16x128xf32, #tpu.memory_space<vmem>>, vector<16x128xf32>
    %cst = arith.constant dense<0.000000e+00> : vector<32x128xf32>
    %2 = tpu.matmul %0, %1, %cst {dimension_numbers = #tpu.dot_dimension_numbers<[1], [0], [0], [1], [0, 0, 1, 1], [], []>} : vector<32x16xf32>, vector<16x128xf32>, vector<32x128xf32> -> vector<32x128xf32>
    %c0_3 = arith.constant 0 : index
    %c0_4 = arith.constant 0 : index
    %3 = vector.load %arg2[%c0_3, %c0_4] : memref<32x1xf32, #tpu.memory_space<vmem>>, vector<32x1xf32>
    %4 = vector.broadcast %3 : vector<32x1xf32> to vector<32x128xf32>
    %5 = arith.addf %2, %4 : vector<32x128xf32>
    %6 = math.absf %5 : vector<32x128xf32>
    %cst_5 = arith.constant 0.000000e+00 : f32
    %7 = vector.broadcast %cst_5 : f32 to vector<32x128xf32>
    %8 = arith.subf %7, %6 : vector<32x128xf32>
    %9 = math.exp %8 : vector<32x128xf32>
    %cst_6 = arith.constant 0.000000e+00 : f32
    %10 = vector.broadcast %cst_6 : f32 to vector<32x128xf32>
    %11 = arith.cmpf oge, %5, %10 : vector<32x128xf32>
    %cst_7 = arith.constant 1.000000e+00 : f32
    %12 = vector.broadcast %cst_7 : f32 to vector<32x128xf32>
    %13 = arith.select %11, %12, %9 : vector<32x128xi1>, vector<32x128xf32>
    %cst_8 = arith.constant 1.000000e+00 : f32
    %14 = vector.broadcast %cst_8 : f32 to vector<32x128xf32>
    %15 = arith.addf %14, %9 : vector<32x128xf32>
    %16 = arith.divf %13, %15 : vector<32x128xf32>
    %c0_9 = arith.constant 0 : index
    %c0_10 = arith.constant 0 : index
    %17 = vector.load %arg5[%c0_9, %c0_10] : memref<32x128xf32, #tpu.memory_space<vmem>>, vector<32x128xf32>
    tpu.vector_store %arg5[%c0_9, %c0_10], %16 {strides = array<i32>} : memref<32x128xf32, #tpu.memory_space<vmem>>, vector<32x128xf32>,
    %cst_11 = arith.constant 1.000000e+00 : f32
    %18 = vector.broadcast %cst_11 : f32 to vector<32x128xf32>
    %19 = arith.subf %18, %16 : vector<32x128xf32>
    %c0_12 = arith.constant 0 : index
    %c0_13 = arith.constant 0 : index
    %20 = vector.load %arg4[%c0_12, %c0_13] : memref<32x128xf32, #tpu.memory_space<vmem>>, vector<32x128xf32>
    tpu.vector_store %arg4[%c0_12, %c0_13], %19 {strides = array<i32>} : memref<32x128xf32, #tpu.memory_space<vmem>>, vector<32x128xf32>,
    return
  }
  func.func @transform_0(%arg0: i32) -> (i32, i32) {
    %c0_i32 = arith.constant 0 : i32
    %c0_i32_0 = arith.constant 0 : i32
    %c0_i32_1 = arith.constant 0 : i32
    return %c0_i32, %c0_i32_0 : i32, i32
  }
  func.func @transform_1(%arg0: i32) -> (i32, i32) {
    %c0_i32 = arith.constant 0 : i32
    %c0_i32_0 = arith.constant 0 : i32
    %c0_i32_1 = arith.constant 0 : i32
    return %c0_i32, %c0_i32_0 : i32, i32
  }
  func.func @transform_2(%arg0: i32) -> (i32, i32) {
    %c0_i32 = arith.constant 0 : i32
    %c0_i32_0 = arith.constant 0 : i32
    return %c0_i32, %arg0 : i32, i32
  }
  func.func @transform_3(%arg0: i32) -> (i32, i32) {
    %c0_i32 = arith.constant 0 : i32
    %c0_i32_0 = arith.constant 0 : i32
    return %c0_i32, %arg0 : i32, i32
  }
  func.func @transform_4(%arg0: i32) -> (i32, i32) {
    %c0_i32 = arith.constant 0 : i32
    %c0_i32_0 = arith.constant 0 : i32
    return %c0_i32, %arg0 : i32, i32
  }
}

</mosaic_0001>

<bundles_post_ra>
// kernel: tpu_custom_call.1
= control target key start
LH: loop header
LB: loop body
LE: loop exit
PB: predicated region body
PF: predicated region fallthrough
CT: control target
= control target key end

     0   :  { %10 = vsyncpa [#allocation3], 0  ;;  %vm48_vm0 = vcmask 130048   ;;  %v323_v5 = vmov 0   ;;  %s418_s0 = inlined_call_operand.vmem [shape: f32[32,16], index: 0, kind: input, shape index: {}]   ;;  %s419_s1 = inlined_call_operand.vmem [shape: f32[32,1], index: 1, kind: input, shape index: {}]   ;;  %s420_s2 = inlined_call_operand.vmem [shape: f32[16,128], index: 2, kind: input, shape index: {}]   ;;  %s421_s3 = inlined_call_operand.hbm [shape: f32[32,128], index: 3, kind: output, shape index: {0}]   ;;  %s422_s4 = inlined_call_operand.hbm [shape: f32[32,128], index: 4, kind: output, shape index: {1}]  }
   0x1   :  { %v22_v0 = vld [vmem:[%s420_s2] sm:$0xff]  ;;  %v23_v1 = vld [vmem:[%s420_s2 + $0x8] sm:$0xff]  ;;  %v20_v4 = vld [vmem:[%s418_s0 + $0x10] sm:$0xff]  ;;  %258 = vset.pattern.permute.xlu1 %v323_v5  ;;  %257 = vset.pattern.permute.xlu0 %v323_v5 }
   0x2   :  { %v18_v2 = vld [vmem:[%s418_s0] sm:$0xff]  ;;  %v246_v3 = vpack.c.bf16 %v23_v1, %v22_v0  ;;  %243 = vmatprep.mubr.msk.f32.mxu1 %vm48_vm0, %v20_v4  ;;  %v26_v6 = vld [vmem:[%s419_s1 + $0x10] sm:$0xff] }
   0x3   :  { %240 = vmatprep.mubr.msk.f32.mxu0 %vm48_vm0, %v18_v2  ;;  %v24_v7 = vld [vmem:[%s419_s1] sm:$0xff] }
   0x4   :  { %247 = vmatprep.subr.bf16.mxu0 %v246_v3  ;;  %250 = vmatprep.subr.bf16.mxu1 %v246_v3 }
   0x5   :  { %11 = vsyncpa [#allocation5], 0  ;;  %249 = vmatpush3.bf16.msra.mxu0 %v246_v3  ;;  %251 = vmatpush3.bf16.msra.mxu1 %v246_v3  ;;  %v19_v8 = vld [vmem:[%s418_s0 + $0x8] sm:$0xff]  ;;  %v21_v9 = vld [vmem:[%s418_s0 + $0x18] sm:$0xff]  ;;  %s324_s0 = smov [#allocation4]   ;;  %s325_s8 = smov [#allocation2]  }
   0x6   :  { %40 = vperm.xlu1 %258, %v26_v6   ;;  %30 = vperm.xlu0 %257, %v24_v7   ;;  %v27_v10 = vld [vmem:[%s419_s1 + $0x18] sm:$0xff]  ;;  %v25_v11 = vld [vmem:[%s419_s1 + $0x8] sm:$0xff]  ;;  %s211_s1 = sshll.u32 %s324_s0, 4  ;;  %s199_s9 = sshll.u32 %s325_s8, 4  ;;  %s212_s1 = int_to_ptr.vmem [resolvable:$true] %s211_s1  ;;  %s387_s9 = int_to_ptr.vmem [resolvable:$true] %s199_s9 }
   0x7   :  { %s275_s10 = scalar_lea.vmem %s212_s1, 512  ;;  %p280_p1 = scmp.lt.s32.totalorder %s212_s1, %s212_s1 }
   0x8   :  { %241 = vmatmul.mubr.msk.f32.vlgmr.msra.gmra.mrb[0].mxu0 %vm48_vm0, %v19_v8  ;;  %244 = vmatmul.mubr.msk.f32.vlgmr.msra.gmra.mrb[0].mxu1 %vm48_vm0, %v21_v9  ;;  %p276_p0 = scmp.ne.s32.totalorder %s212_s1, %s275_s10  ;;  %p281_p2 = scmp.lt.s32.totalorder %s275_s10, %s275_s10 }
   0xa   :  { %45 = vperm.xlu1 %258, %v27_v10   ;;  %35 = vperm.xlu0 %257, %v25_v11   ;;  %p282_p3 = por %p281_p2, %p280_p1 }
   0xc   :  { %p283_p4 = pnand %p282_p3, %p276_p0 }
  0x85   :  { %v41_v12 = vpop.permute.xlu1 %40  ;;  %v31_v13 = vpop.permute.xlu0 %30 }
  0x89   :  { %v46_v14 = vpop.permute.xlu1 %45  ;;  %v36_v15 = vpop.permute.xlu0 %35 }
  0xdb   :  { %v242_v16 = vpop.f32.mrb[0].mxu0  ;;  %v245_v17 = vpop.f32.mrb[0].mxu1 }
  0xdc   :  { %v133_v18 = vadd.f32 %v242_v16, %v36_v15  ;;  %v143_v19 = vadd.f32 %v245_v17, %v46_v14  ;;  %v127_v20 = vpop.f32.mrb[1].mxu0  ;;  %v137_v21 = vpop.f32.mrb[1].mxu1 }
  0xdd   :  { %v128_v22 = vadd.f32 %v127_v20, %v31_v13  ;;  %v138_v23 = vadd.f32 %v137_v21, %v41_v12 }
  0xde   :  { %v147_v24 = vand.u32 2147483647, %v133_v18  ;;  %v149_v25 = vand.u32 2147483647, %v143_v19  ;;  %vm163_vm1 = vcmp.ge.f32.partialorder %v133_v18, 0.0  ;;  %vm165_vm2 = vcmp.ge.f32.partialorder %v143_v19, 0.0 }
  0xdf   :  { %v146_v26 = vand.u32 2147483647, %v128_v22  ;;  %v148_v27 = vand.u32 2147483647, %v138_v23  ;;  %vm162_vm3 = vcmp.ge.f32.partialorder %v128_v22, 0.0  ;;  %vm164_vm4 = vcmp.ge.f32.partialorder %v138_v23, 0.0 }
  0xe0   :  { %v151_v28 = vsub.f32 0.0, %v147_v24  ;;  %v153_v29 = vsub.f32 0.0, %v149_v25 }
  0xe1   :  { %v150_v30 = vsub.f32 0.0, %v146_v26  ;;  %v152_v31 = vsub.f32 0.0, %v148_v27 }
  0xe2   :  { %v156_v32 = vmul.f32 1.442695, %v151_v28  ;;  %v160_v33 = vmul.f32 1.442695, %v153_v29 }
  0xe3   :  { %v154_v34 = vmul.f32 1.442695, %v150_v30  ;;  %v158_v35 = vmul.f32 1.442695, %v152_v31 }
  0xe4   :  { %259 = vpow2.f32 %v156_v32 }
  0xe5   :  { %261 = vpow2.f32 %v160_v33 }
  0xe6   :  { %263 = vpow2.f32 %v154_v34 }
  0xe7   :  { %265 = vpow2.f32 %v158_v35 }
  0xee   :  { %v260_v36 = vpop.eup %259 }
  0xef   :  { %v262_v37 = vpop.eup %261  ;;  %v171_v38 = vadd.f32 1.0, %v260_v36  ;;  %v167_v45 = vsel %vm163_vm1, 1.0, %v260_v36 }
  0xf0   :  { %v264_v39 = vpop.eup %263  ;;  %v173_v40 = vadd.f32 1.0, %v262_v37  ;;  %v169_v48 = vsel %vm165_vm2, 1.0, %v262_v37 }
  0xf1   :  { %v266_v41 = vpop.eup %265  ;;  %267 = vrcp.f32 %v171_v38  ;;  %v170_v42 = vadd.f32 1.0, %v264_v39  ;;  %v166_v51 = vsel %vm162_vm3, 1.0, %v264_v39 }
  0xf2   :  { %269 = vrcp.f32 %v173_v40  ;;  %v172_v43 = vadd.f32 1.0, %v266_v41  ;;  %v168_v55 = vsel %vm164_vm4, 1.0, %v266_v41 }
  0xf3   :  { %271 = vrcp.f32 %v170_v42 }
  0xf4   :  { %273 = vrcp.f32 %v172_v43 }
  0xfb   :  { %v268_v44 = vpop.eup %267 }
  0xfc   :  { %v270_v46 = vpop.eup %269  ;;  %v177_v47 = vmul.f32 %v268_v44, %v167_v45 }
  0xfd   :  { %v272_v49 = vpop.eup %271  ;;  %v181_v50 = vmul.f32 %v270_v46, %v169_v48 }
  0xfe   :  { %v274_v52 = vpop.eup %273  ;;  %183 = vst [vmem:[#allocation4 + $0x8] sm:$0xff] %v177_v47  ;;  %v187_v53 = vsub.f32 1.0, %v177_v47  ;;  %v175_v54 = vmul.f32 %v272_v49, %v166_v51 }
  0xff   :  { %185 = vst [vmem:[#allocation4 + $0x18] sm:$0xff] %v181_v50  ;;  %v189_v56 = vsub.f32 1.0, %v181_v50  ;;  %v179_v57 = vmul.f32 %v274_v52, %v168_v55 }
 0x100   :  { %191 = vst [vmem:[#allocation2 + $0x8] sm:$0xff] %v187_v53  ;;  %182 = vst [vmem:[#allocation4] sm:$0xff] %v175_v54  ;;  %v186_v58 = vsub.f32 1.0, %v175_v54 }
 0x101   :  { %193 = vst [vmem:[#allocation2 + $0x18] sm:$0xff] %v189_v56  ;;  %184 = vst [vmem:[#allocation4 + $0x10] sm:$0xff] %v179_v57  ;;  %v188_v59 = vsub.f32 1.0, %v179_v57 }
 0x102   :  { %190 = vst [vmem:[#allocation2] sm:$0xff] %v186_v58 }
 0x103   :  { %286 = shalt.err (!%p283_p4)
}
 0x104   :  { %s287_s13 = scalar_lea.hbm %s422_s4, 512 }
 0x105   :  { %p288_p5 = scmp.ne.s32.totalorder %s422_s4, %s287_s13  ;;  %p291_p6 = scmp.lt.u32.totalorder %s287_s13, %s422_s4 }
 0x107   :  { %p293_p7 = pnand %p291_p6, %p288_p5 }
 0x109   :  { %296 = shalt.err (!%p293_p7)
}
 0x10a   :  { %s326_s18 = smov 128   ;;  %s327_s19 = smov 8   ;;  %192 = vst [vmem:[#allocation2 + $0x10] sm:$0xff] %v188_v59 }
 0x10b   :  { %217 = dma.vmem_to_hbm [thread:$0]  %s212_s1, 512, %s422_s4, [#allocation5], %s326_s18, %s326_s18, %s327_s19  }
 0x10c   :  { %s297_s22 = scalar_lea.vmem %s387_s9, 512  ;;  %p302_p9 = scmp.lt.s32.totalorder %s387_s9, %s387_s9 }
 0x10d   :  { %p298_p8 = scmp.ne.s32.totalorder %s387_s9, %s297_s22  ;;  %p303_p10 = scmp.lt.s32.totalorder %s297_s22, %s297_s22 }
 0x10f   :  { %p304_p11 = por %p303_p10, %p302_p9 }
 0x111   :  { %p305_p12 = pnand %p304_p11, %p298_p8 }
 0x113   :  { %308 = shalt.err (!%p305_p12)
}
 0x114   :  { %s309_s2 = scalar_lea.hbm %s421_s3, 512 }
 0x115   :  { %p310_p13 = scmp.ne.s32.totalorder %s421_s3, %s309_s2  ;;  %p313_p0 = scmp.lt.u32.totalorder %s309_s2, %s421_s3 }
 0x117   :  { %p315_p1 = pnand %p313_p0, %p310_p13 }
 0x119   :  { %318 = shalt.err (!%p315_p1)
}
 0x11a   :  { %205 = dma.vmem_to_hbm [thread:$0]  %s387_s9, 512, %s421_s3, [#allocation3], %s326_s18, %s326_s18, %s327_s19  }
 0x11b   :  { %319 = dma.done.wait [#allocation3], 512  }
 0x11c   :  { %320 = vsyncadd [#allocation3], 4294966784 }
 0x11d   :  { %321 = dma.done.wait [#allocation5], 512  }
 0x11e   :  { %322 = vsyncadd [#allocation5], 4294966784 }
 0x11f   :  { %224 = vsyncpa [#allocation3], 1 }
 0x120   :  { %225 = vsyncpa [#allocation5], 1 }

</bundles_post_ra>
